<compile_context>
chip_gen: v7x
topology: tpu7x:2x2x1
jax: 0.10.0
libtpu: 0.0.40
codegen_flags: <defaults>
</compile_context>

<pallas_src>
import functools
import math

import jax
import jax.numpy as jnp
from jax.experimental import pallas as pl
from jax.experimental.pallas import tpu as pltpu


_TILE_TARGET_BYTES = 4 * 1024 * 1024   # ~4 MiB f32 output block per grid step
_VMEM_LIMIT_BYTES = 32 * 1024 * 1024   # 2x in + 2x out + v scratch ~= 20 MiB live


def _cdiv(a, b):
    return -(-a // b)


def _round_up(a, b):
    return _cdiv(a, b) * b


def _if_kernel(x_ref, spike_ref, v_ref, *, v_threshold):
    # x_ref:     (1, tile_rows, lw) block, native input dtype
    # spike_ref: (1, tile_rows, lw) block, float32
    # v_ref:     (tile_rows, lw) f32 scratch -- membrane potential, persists over T.
    t = pl.program_id(1)

    @pl.when(t == 0)
    def _():
        v_ref[...] = jnp.zeros_like(v_ref)

    v = v_ref[...] + x_ref[0].astype(jnp.float32)
    ge = v >= v_threshold
    spike_ref[0] = ge.astype(spike_ref.dtype)
    v_ref[...] = jnp.where(ge, v - v_threshold, v)   # soft reset


def _choose_lane_width(E):
    """Largest of {512, 256, 128} dividing E (no lane padding); else 128 + pad."""
    for cand in (512, 256, 128):
        if E % cand == 0:
            return cand, 0
    return 128, _round_up(E, 128) - E


def _choose_row_tiling(r, row_align, max_rows):
    """Return (tile_rows, num_tiles). Prefers >=2 balanced tiles (v7x megacore);
    a partial final block (tile_rows not dividing r) is masked by Pallas."""
    if r <= max_rows and r < 2 * row_align:
        return r, 1                                   # single full-extent block
    num_tiles = max(_cdiv(r, max_rows), 2)            # >=2 row tiles when splittable
    if num_tiles > 2:
        num_tiles = _round_up(num_tiles, 2)           # even count -> 2-TC balance
    tile_rows = _round_up(_cdiv(r, num_tiles), row_align)
    num_tiles = _cdiv(r, tile_rows)
    return tile_rows, num_tiles


def multi_step_if_node(x_seq, v_threshold=1.0, detach_reset=True):
    """x_seq: (T, B, C, H, W) any float dtype -> spike_seq: same shape, float32."""
    del detach_reset  # gradient-only flag; forward pass unaffected
    T = x_seq.shape[0]
    E = math.prod(x_seq.shape[1:])
    itemsize = jnp.dtype(x_seq.dtype).itemsize

    lw, lane_pad = _choose_lane_width(E)
    E_lanes = E + lane_pad
    r = E_lanes // lw

    # Sublane alignment for the native-dtype input block (f32->8, bf16->16, i8->32).
    row_align = {4: 8, 2: 16, 1: 32}.get(itemsize, 8)
    max_rows = max(row_align,
                   (_TILE_TARGET_BYTES // (lw * 4)) // row_align * row_align)
    tile_rows, num_tiles = _choose_row_tiling(r, row_align, max_rows)

    x2d = x_seq.reshape(T, E)
    if lane_pad:
        # Rare path (E not divisible by 128): one extra HBM pass for padding.
        x2d = jnp.pad(x2d, ((0, 0), (0, lane_pad)))
    x3d = x2d.reshape(T, r, lw)          # metadata-only reshape (native dtype)

    kernel = functools.partial(_if_kernel, v_threshold=float(v_threshold))

    spike3d = pl.pallas_call(
        kernel,
        out_shape=jax.ShapeDtypeStruct((T, r, lw), jnp.float32),
        grid_spec=pltpu.PrefetchScalarGridSpec(
            num_scalar_prefetch=0,
            grid=(num_tiles, T),
            in_specs=[pl.BlockSpec((1, tile_rows, lw), lambda i, t: (t, i, 0))],
            out_specs=pl.BlockSpec((1, tile_rows, lw), lambda i, t: (t, i, 0)),
            scratch_shapes=[pltpu.VMEM((tile_rows, lw), jnp.float32)],
        ),
        compiler_params=pltpu.CompilerParams(
            dimension_semantics=("parallel", "arbitrary"),
            vmem_limit_bytes=_VMEM_LIMIT_BYTES,
        ),
        cost_estimate=pl.CostEstimate(
            flops=3 * T * r * lw,
            transcendentals=0,
            bytes_accessed=T * r * lw * (itemsize + 4),
        ),
    )(x3d)

    spike = spike3d.reshape(T, E_lanes)
    if lane_pad:
        spike = spike[:, :E]
    return spike.reshape(x_seq.shape)


def _reference(x_seq, v_threshold=1.0):
    T = x_seq.shape[0]
    v = jnp.zeros(x_seq.shape[1:], dtype=jnp.float32)
    spikes = []
    for t in range(T):
        v = v + x_seq[t]
        s = (v >= v_threshold).astype(jnp.float32)
        v = v - s * v_threshold
        spikes.append(s)
    return jnp.stack(spikes)


if __name__ == "__main__":
    key = jax.random.PRNGKey(0)
    k1, k2 = jax.random.split(key)

    # Primary test: module-sized f32 input (single full-extent row tile path).
    T, B, C, H, W = 8, 2, 4, 16, 16
    x_f32 = jax.random.normal(k1, (T, B, C, H, W), dtype=jnp.float32)
    spikes = jax.block_until_ready(
        multi_step_if_node(x_f32, v_threshold=1.0, detach_reset=True))
    assert spikes.shape == (T, B, C, H, W)
    assert spikes.dtype == jnp.float32
    assert jnp.array_equal(spikes, _reference(x_f32)), "f32 mismatch vs reference"

    # Secondary test: bf16 input (native-dtype DMA) exercising the >=2-row-tile
    # parallel path (E = 2*8*32*32 = 16384 -> lw=512, r=32, 2 tiles of 16 rows).
    T2, B2, C2, H2, W2 = 4, 2, 8, 32, 32
    x_bf16 = jax.random.normal(k2, (T2, B2, C2, H2, W2), dtype=jnp.bfloat16)
    spikes2 = jax.block_until_ready(
        multi_step_if_node(x_bf16, v_threshold=1.0, detach_reset=True))
    assert spikes2.shape == (T2, B2, C2, H2, W2)
    assert spikes2.dtype == jnp.float32
    assert jnp.array_equal(spikes2, _reference(x_bf16)), "bf16 mismatch vs reference"

    print("KERNEL_OK")
</pallas_src>

<mosaic_0001>
module attributes {stable_mosaic.version = 11 : i64} {
  func.func @_if_kernel(%arg0: i32, %arg1: i32, %arg2: memref<1x4x512xf32, #tpu.memory_space<vmem>>, %arg3: memref<1x4x512xf32, #tpu.memory_space<vmem>>, %arg4: memref<4x512xf32, #tpu.memory_space<vmem>>) attributes {dimension_semantics = [#tpu.dimension_semantics<parallel>, #tpu.dimension_semantics<arbitrary>], iteration_bounds = array<i64: 1, 8>, scalar_prefetch = 0 : i64, scratch_operands = 1 : i64, tpu.core_type = #tpu.core_type<tc>, window_params = [{transform_indices = @transform_0, window_bounds = array<i64: 1, 4, 512>}, {transform_indices = @transform_1, window_bounds = array<i64: 1, 4, 512>}]} {
    %c0_i32 = arith.constant 0 : i32
    %0 = arith.cmpi eq, %arg1, %c0_i32 : i32
    %1 = arith.extui %0 : i1 to i32
    %c0_i32_0 = arith.constant 0 : i32
    %2 = arith.cmpi ne, %1, %c0_i32_0 : i32
    scf.if %2 {
      %cst_11 = arith.constant 0.000000e+00 : f32
      %18 = vector.broadcast %cst_11 : f32 to vector<4x512xf32>
      %c0_12 = arith.constant 0 : index
      %c0_13 = arith.constant 0 : index
      %19 = vector.load %arg4[%c0_12, %c0_13] : memref<4x512xf32, #tpu.memory_space<vmem>>, vector<4x512xf32>
      tpu.vector_store %arg4[%c0_12, %c0_13], %18 {strides = array<i32>} : memref<4x512xf32, #tpu.memory_space<vmem>>, vector<4x512xf32>,
    } else {
    }
    %c0 = arith.constant 0 : index
    %c0_1 = arith.constant 0 : index
    %3 = vector.load %arg4[%c0, %c0_1] : memref<4x512xf32, #tpu.memory_space<vmem>>, vector<4x512xf32>
    %c0_2 = arith.constant 0 : index
    %c0_3 = arith.constant 0 : index
    %c0_4 = arith.constant 0 : index
    %4 = vector.load %arg2[%c0_2, %c0_3, %c0_4] : memref<1x4x512xf32, #tpu.memory_space<vmem>>, vector<1x4x512xf32>
    %5 = vector.shape_cast %4 : vector<1x4x512xf32> to vector<4x512xf32>
    %6 = arith.addf %3, %5 : vector<4x512xf32>
    %cst = arith.constant 1.000000e+00 : f32
    %7 = vector.broadcast %cst : f32 to vector<4x512xf32>
    %8 = arith.cmpf oge, %6, %7 : vector<4x512xf32>
    %9 = arith.extui %8 : vector<4x512xi1> to vector<4x512xi32>
    %10 = arith.sitofp %9 : vector<4x512xi32> to vector<4x512xf32>
    %c0_5 = arith.constant 0 : index
    %c0_6 = arith.constant 0 : index
    %c0_7 = arith.constant 0 : index
    %11 = vector.load %arg3[%c0_5, %c0_6, %c0_7] : memref<1x4x512xf32, #tpu.memory_space<vmem>>, vector<1x4x512xf32>
    %12 = vector.shape_cast %11 : vector<1x4x512xf32> to vector<4x512xf32>
    %13 = vector.shape_cast %10 : vector<4x512xf32> to vector<1x4x512xf32>
    tpu.vector_store %arg3[%c0_5, %c0_6, %c0_7], %13 {strides = array<i32>} : memref<1x4x512xf32, #tpu.memory_space<vmem>>, vector<1x4x512xf32>,
    %cst_8 = arith.constant 1.000000e+00 : f32
    %14 = vector.broadcast %cst_8 : f32 to vector<4x512xf32>
    %15 = arith.subf %6, %14 : vector<4x512xf32>
    %16 = arith.select %8, %15, %6 : vector<4x512xi1>, vector<4x512xf32>
    %c0_9 = arith.constant 0 : index
    %c0_10 = arith.constant 0 : index
    %17 = vector.load %arg4[%c0_9, %c0_10] : memref<4x512xf32, #tpu.memory_space<vmem>>, vector<4x512xf32>
    tpu.vector_store %arg4[%c0_9, %c0_10], %16 {strides = array<i32>} : memref<4x512xf32, #tpu.memory_space<vmem>>, vector<4x512xf32>,
    return
  }
  func.func @transform_0(%arg0: i32, %arg1: i32) -> (i32, i32, i32) {
    %c0_i32 = arith.constant 0 : i32
    %c0_i32_0 = arith.constant 0 : i32
    return %arg1, %arg0, %c0_i32 : i32, i32, i32
  }
  func.func @transform_1(%arg0: i32, %arg1: i32) -> (i32, i32, i32) {
    %c0_i32 = arith.constant 0 : i32
    %c0_i32_0 = arith.constant 0 : i32
    return %arg1, %arg0, %c0_i32 : i32, i32, i32
  }
}

</mosaic_0001>

<bundles_post_ra>
// kernel: tpu_custom_call.1
= control target key start
LH: loop header
LB: loop body
LE: loop exit
PB: predicated region body
PF: predicated region fallthrough
CT: control target
= control target key end

     0   :  { %6 = vsyncpa [#allocation4], 0  ;;  %s663_s0 = inlined_call_operand.hbm [shape: f32[8,4,512], index: 0, kind: input, shape index: {}]   ;;  %s664_s1 = inlined_call_operand.hbm [shape: f32[8,4,512], index: 1, kind: output, shape index: {}]  }
   0x1   :  { %8 = vsyncpa [#allocation4 + $0x1], 0 }
   0x2   :  { %9 = vsyncpa [#allocation5], 0 }
   0x3   :  { %11 = vsyncpa [#allocation5 + $0x1], 0  ;;  %s492_s6 = smov 0   ;;  %s494_s7 = smov 0  }
   0x4   :  { %s496_s8 = smov 0   ;;  %s498_s9 = smov 0  }
   0x5   :  { %s500_s10 = smov 0   ;;  %s502_s11 = smov 0  }
   0x6 LB: > { %s278_s12 = sadd.s32 4294967295, %s476_s11   ;;  %s279_s13 = sadd.s32 4294967294, %s476_s11   ;;  %s476_s11 = sphi %s502_s11, %s17_s11   ;;  %s472_s10 = sphi %s500_s10, %s679_s10   ;;  %s468_s9 = sphi %s498_s9, %s678_s9   ;;  %s464_s8 = sphi %s496_s8, %s677_s8   ;;  %s460_s7 = sphi %s494_s7, %s676_s7   ;;  %s456_s6 = sphi %s492_s6, %s675_s6  }
   0x7   : > { %s26_s14 = sadd.s32 1, %s472_s10  ;;  %s38_s15 = sadd.s32 1, %s464_s8 }
   0x8   : > { %p27_p0 = scmp.ge.s32.totalorder %s26_s14, 8  ;;  %p45_p1 = scmp.ne.s32.totalorder %s464_s8, %s460_s7 }
   0x9   : > { %p46_p2 = scmp.eq.s32.totalorder %s476_s11, 0  ;;  %p51_p3 = scmp.ne.s32.totalorder %s460_s7, %s456_s6 }
   0xa   : > { %s681_s14 = smov (%p27_p0, %s26_s14), 0  ;;  %p52_p5 = scmp.eq.s32.totalorder %s278_s12, 0 }
   0xb   : > { %p533_p4 = por %p46_p2, %p45_p1  ;;  %s33_s17 = ssub.s32 %s472_s10, %s681_s14 }
   0xc   : > { %p77_p6 = scmp.eq.s32.totalorder %s278_s12, 7  ;;  %p36_p7 = scmp.eq.s32.totalorder %s33_s17, 0 }
   0xd   : > { %p539_p8 = por %p52_p5, %p51_p3  ;;  %p83_p10 = scmp.eq.s32.totalorder %s279_s13, 7 }
   0xe   : > { %p543_p9 = por %p77_p6, %p45_p1  ;;  %p312_p12 = scmp.lt.s32.totalorder %s476_s11, 8 }
   0xf   : > { %s548_s20 = scalar_select %p36_p7, %s464_s8, %s38_s15  }
  0x10   : > { %s668_s19 = scalar_select %p543_p9, 1, 0 }
  0x11   : > { %p550_p11 = por %p83_p10, %p51_p3  ;;  %s103_s22 = sand.u32 1, %s464_s8  }
  0x12   : > { %s282_s23 = sshll.u32 %s103_s22, 4  ;;  %s298_s24 = sshll.u32 %s472_s10, 8 }
  0x13   : > { %s669_s21 = scalar_select %p550_p11, 1, 0 }
  0x14   : > { %s560_s27 = scalar_lea.hbm %s663_s0, %s298_s24  ;;  %s107_s28 = scalar_lea.vmem [#allocation3], %s282_s23 }
  0x15   : > { %s117_s29 = sshll.u32 %s107_s28, 4  ;;  %p566_p13 = pnand %p312_p12, %p533_p4  ;;  %s562_s29 = int_to_ptr.vmem [resolvable:$true] %s117_s29 }
  0x16   : > { %s104_s2 = scalar_lea.sflag [#allocation4], %s103_s22  ;;  %s364_s3 = scalar_lea.hbm %s560_s27, 256 }
  0x17   : > { %p365_p2 = scmp.ne.s32.totalorder %s560_s27, %s364_s3  ;;  %p366_p3 = pneg %p566_p13 }
  0x18   : > { %s369_s12 = scalar_lea.hbm %s663_s0, 2048  ;;  %p370_p4 = scmp.lt.u32.totalorder %s560_s27, %s663_s0 }
  0x19   : > { %p367_p5 = pnand %p366_p3, %p365_p2  ;;  %p371_p7 = scmp.lt.u32.totalorder %s369_s12, %s364_s3 }
  0x1a   : > { %p373_p12 = scmp.lt.u32.totalorder %s364_s3, %s560_s27 }
  0x1b   : > { %p368_p6 = pneg %p367_p5  ;;  %p372_p10 = por %p371_p7, %p370_p4 }
  0x1d   : > { %p374_p0 = por %p373_p12, %p372_p10 }
  0x1f   : > { %p375_p1 = pnand %p374_p0, %p368_p6 }
  0x21   : > { %378 = shalt.err (!%p375_p1)
}
  0x22   : > { %s379_s16 = scalar_lea.vmem %s562_s29, 256  ;;  %s478_s17 = smov [#allocation3]  }
  0x23   : > { %p380_p2 = scmp.ne.s32.totalorder %s562_s29, %s379_s16  ;;  %s384_s22 = sshll.u32 %s478_s17, 4  ;;  %s385_s22 = int_to_ptr.vmem [resolvable:$false] %s384_s22 }
  0x24   : > { %s386_s23 = scalar_lea.vmem %s385_s22, 512  ;;  %p387_p9 = scmp.lt.s32.totalorder %s562_s29, %s385_s22 }
  0x25   : > { %p382_p5 = pnand %p380_p2, %p366_p3  ;;  %p388_p4 = scmp.lt.s32.totalorder %s386_s23, %s379_s16 }
  0x27   : > { %p383_p11 = pneg %p382_p5  ;;  %p389_p7 = por %p388_p4, %p387_p9 }
  0x29   : > { %p390_p10 = pnand %p389_p7, %p383_p11 }
  0x2b   : > { %393 = shalt.err (!%p390_p10)
}
  0x2c   : > { %307 = dma.hbm_to_vmem [thread:$0]  (!%p566_p13), %s560_s27, 256, %s562_s29, %s104_s2  }
  0x2d   : > { %p671_p0 = scmp.lt.s32.totalorder %s476_s11, 9  ;;  %p672_p1 = scmp.ge.s32.totalorder %s476_s11, 1 }
  0x2f   : > { %p123_p3 = pnand %p672_p1, %p671_p0 }
  0x30   : > { %s602_s24 = sand.u32 (!%p123_p3), 1, %s460_s7  }
  0x31   : > { %126 = sbr.rel (%p123_p3) target bundleno = 91 (0x5b), region = 24  ;;  %s286_s25 = sshll.u32 (!%p123_p3), %s602_s24, 4 }
  0x32   : > { %s129_s26 = scalar_lea.sflag (!%p123_p3), [#allocation4], %s602_s24  ;;  %s132_s28 = scalar_lea.vmem (!%p123_p3), [#allocation3], %s286_s25 }
  0x38   : > { %447 = dma.done.wait (%p539_p8), %s129_s26, 256  }
  0x39   : > { %449 = vsyncadd (%p539_p8), %s129_s26, 4294967040  ;;  %s150_s30 = scalar_lea.vmem [#allocation6], %s286_s25  ;;  %p288_p9 = scmp.ne.s32.totalorder %s468_s9, 0 }
  0x3a   : > { %v479_v0 = vmov (!%p288_p9), 0.0  }
  0x3b   : > { %154 = sbr.rel (%p288_p9) target bundleno = 66 (0x42), region = 32  ;;  %155 = vst [vmem:[#allocation2] sm:$0xff] (!%p288_p9), %v479_v0  ;;  %156 = vst [vmem:[#allocation2 + $0x8] sm:$0xff] (!%p288_p9), %v479_v0 }
  0x42 PF: > { %v157_v1 = vld [vmem:[#allocation2] sm:$0xff]  ;;  %v158_v3 = vld [vmem:[#allocation2 + $0x8] sm:$0xff]  ;;  %s299_s27 = sshll.u32 %s468_s9, 8  ;;  %s194_s29 = sshll.u32 %s150_s30, 4  ;;  %v480_v8 = vmov 0.0   ;;  %s617_s29 = int_to_ptr.vmem [resolvable:$true] %s194_s29 }
  0x43   : > { %v159_v2 = vld [vmem:[%s132_s28] sm:$0xff]  ;;  %v160_v5 = vld [vmem:[%s132_s28 + $0x8] sm:$0xff]  ;;  %s615_s3 = scalar_lea.hbm %s664_s1, %s299_s27  ;;  %s178_s9 = scalar_lea.sflag [#allocation5], %s602_s24 }
  0x44   : > { %v161_v4 = vadd.f32 %v159_v2, %v157_v1  ;;  %v162_v6 = vadd.f32 %v160_v5, %v158_v3  ;;  %s394_s4 = scalar_lea.vmem %s617_s29, 256  ;;  %p673_p11 = scmp.ne.s32.totalorder %s668_s19, 0 }
  0x45   : > { %p395_p8 = scmp.ne.s32.totalorder %s617_s29, %s394_s4  ;;  %s481_s5 = smov [#allocation6]  }
  0x46   : > { %vm163_vm0 = vcmp.ge.f32.partialorder %v161_v4, 1.0  ;;  %v291_v7 = vadd.f32 -1.0, %v161_v4  ;;  %vm164_vm1 = vcmp.ge.f32.partialorder %v162_v6, 1.0  ;;  %v292_v10 = vadd.f32 -1.0, %v162_v6  ;;  %s398_s12 = sshll.u32 %s481_s5, 4  ;;  %s399_s12 = int_to_ptr.vmem [resolvable:$false] %s398_s12 }
  0x47   : > { %v289_v9 = vsel %vm163_vm0, 1.0, %v480_v8  ;;  %v290_v11 = vsel %vm164_vm1, 1.0, %v480_v8  ;;  %p396_p13 = pnand %p395_p8, %p673_p11  ;;  %s400_s13 = scalar_lea.vmem %s399_s12, 512 }
  0x48   : > { %169 = vst [vmem:[%s150_s30] sm:$0xff] %v289_v9  ;;  %v173_v12 = vsel %vm163_vm0, %v291_v7, %v161_v4  ;;  %170 = vst [vmem:[%s150_s30 + $0x8] sm:$0xff] %v290_v11  ;;  %v174_v13 = vsel %vm164_vm1, %v292_v10, %v162_v6  ;;  %p401_p12 = scmp.lt.s32.totalorder %s617_s29, %s399_s12  ;;  %p402_p2 = scmp.lt.s32.totalorder %s400_s13, %s394_s4 }
  0x49   : > { %175 = vst [vmem:[#allocation2] sm:$0xff] %v173_v12  ;;  %176 = vst [vmem:[#allocation2 + $0x8] sm:$0xff] %v174_v13  ;;  %p397_p6 = pneg %p396_p13 }
  0x4a   : > { %p403_p5 = por %p402_p2, %p401_p12 }
  0x4c   : > { %p404_p4 = pnand %p403_p5, %p397_p6 }
  0x4e   : > { %407 = shalt.err (!%p404_p4)
}
  0x4f   : > { %s408_s15 = scalar_lea.hbm %s615_s3, 256  ;;  %s412_s22 = scalar_lea.hbm %s664_s1, 2048 }
  0x50   : > { %p409_p7 = scmp.ne.s32.totalorder %s615_s3, %s408_s15  ;;  %p413_p1 = scmp.lt.u32.totalorder %s615_s3, %s664_s1 }
  0x51   : > { %p414_p3 = scmp.lt.u32.totalorder %s412_s22, %s408_s15  ;;  %p416_p8 = scmp.lt.u32.totalorder %s408_s15, %s615_s3 }
  0x52   : > { %p410_p10 = pnand %p409_p7, %p673_p11 }
  0x53   : > { %p415_p9 = por %p414_p3, %p413_p1 }
  0x54   : > { %p411_p0 = pneg %p410_p10 }
  0x55   : > { %p417_p13 = por %p416_p8, %p415_p9 }
  0x57   : > { %p418_p6 = pnand %p417_p13, %p411_p0 }
  0x59   : > { %421 = shalt.err (!%p418_p6)
}
  0x5a   : > { %302 = dma.vmem_to_hbm [thread:$0]  (%p673_p11), %s617_s29, 256, %s615_s3, %s178_s9  }
  0x5b PF: > { %p313_p12 = scmp.ge.s32.totalorder %s476_s11, 2  ;;  %s206_s25 = sand.u32 1, %s456_s6  }
  0x5c   : > { %p674_p2 = scmp.ne.s32.totalorder %s669_s21, 0  ;;  %s207_s26 = scalar_lea.sflag [#allocation5], %s206_s25 }
  0x5e   : > { %p309_p5 = pnand %p313_p12, %p674_p2 }
  0x60   : > { %451 = dma.done.wait (!%p309_p5), %s207_s26, 256  }
  0x61   : > { %453 = vsyncadd (!%p309_p5), %s207_s26, 4294967040  ;;  %s17_s11 = sadd.s32 1, %s476_s11   ;;  %s675_s6 = smov %s460_s7 }
  0x62   : > { %p14_p4 = scmp.ge.s32.totalorder %s17_s11, 10   ;;  %s676_s7 = smov %s464_s8 }
  0x63   : > { %s677_s8 = smov %s548_s20  ;;  %s678_s9 = smov %s472_s10 }
  0x64   : > { %s679_s10 = smov %s681_s14  ;;  %16 = sbr.rel (!%p14_p4) target bundleno = 6 (0x6), region = 73 }
  0x6b   :  { %212 = vsyncpa [#allocation4], 1 }
  0x6c   :  { %214 = vsyncpa [#allocation4 + $0x1], 1 }
  0x6d   :  { %215 = vsyncpa [#allocation5], 1 }
  0x6e   :  { %217 = vsyncpa [#allocation5 + $0x1], 1 }

</bundles_post_ra>
